<compile_context>
chip_gen: v7x
topology: tpu7x:2x2x1
jax: 0.10.0
libtpu: 0.0.40
codegen_flags: <defaults>
</compile_context>

<pallas_src>
import jax
import jax.numpy as jnp
from jax.experimental import pallas as pl
from jax.experimental.pallas import tpu as pltpu

# Batch rows per grid step when the gridded (large-batch) path is used.
_BLOCK_B = 512


def _qc_kernel(x_ref, p_ref, ry_ref, rz_ref, a0r_ref, a0i_ref, a1r_ref, a1i_ref):
    """x_ref: (BB, N) data values; p_ref: (1, N) trainable params.

    Outputs (each (BB, N) f32): ry angles, rz angles, Re/Im(amp0), Re/Im(amp1).
    """
    x = x_ref[...]            # (BB, N)
    theta = p_ref[...]        # (1, N) -> broadcast over the batch (sublane) axis

    ry = x * theta            # qc.ry(val * theta, i)
    rz = ry * 0.5             # qc.rz(val * theta / 2, i)

    half_ry = ry * 0.5
    half_rz = ry * 0.25       # rz / 2
    c_ry = jnp.cos(half_ry)
    s_ry = jnp.sin(half_ry)
    c_rz = jnp.cos(half_rz)
    s_rz = jnp.sin(half_rz)

    ry_ref[...] = ry
    rz_ref[...] = rz
    # State after the per-qubit gates in circuit order: RZ(rz) @ RY(ry) @ |0>
    #   amp0 = cos(ry/2) * e^{-i rz/2},  amp1 = sin(ry/2) * e^{+i rz/2}
    a0r_ref[...] = c_ry * c_rz
    a0i_ref[...] = -c_ry * s_rz
    a1r_ref[...] = s_ry * c_rz
    a1i_ref[...] = s_ry * s_rz


def _cost_estimate(rows, n):
    elems = rows * n
    return pl.CostEstimate(
        flops=8 * elems,
        transcendentals=4 * elems,
        bytes_accessed=4 * (7 * elems + n),
    )


def quantum_circuit_params_forward_batched(data_mat, trainable_params,
                                           block_b=_BLOCK_B):
    """Batched forward: data_mat (B, num_qubits), trainable_params (num_qubits,).

    Returns (ry, rz, amp0, amp1), each of shape (B, num_qubits); amp0/amp1 are
    complex64 per-qubit amplitudes after the RY/RZ gates (before the CX chain).
    """
    B, n = data_mat.shape
    assert trainable_params.shape == (n,)

    x = data_mat.astype(jnp.float32)
    p2 = trainable_params.astype(jnp.float32).reshape(1, n)

    if B <= block_b:
        # Grid-free path: whole arrays as single VMEM blocks.
        out_shapes = tuple(
            jax.ShapeDtypeStruct((B, n), jnp.float32) for _ in range(6))
        outs = pl.pallas_call(
            _qc_kernel,
            out_shape=out_shapes,
            in_specs=[
                pl.BlockSpec(memory_space=pltpu.MemorySpace.VMEM),
                pl.BlockSpec(memory_space=pltpu.MemorySpace.VMEM),
            ],
            out_specs=tuple(
                pl.BlockSpec(memory_space=pltpu.MemorySpace.VMEM)
                for _ in range(6)),
            cost_estimate=_cost_estimate(B, n),
        )(x, p2)
    else:
        # Gridded path: parallel over batch blocks (megacore split on v7x).
        b_pad = ((B + block_b - 1) // block_b) * block_b
        if b_pad != B:
            x = jnp.pad(x, ((0, b_pad - B), (0, 0)))
        out_shapes = tuple(
            jax.ShapeDtypeStruct((b_pad, n), jnp.float32) for _ in range(6))
        outs = pl.pallas_call(
            _qc_kernel,
            out_shape=out_shapes,
            grid=(b_pad // block_b,),
            in_specs=[
                pl.BlockSpec((block_b, n), lambda b: (b, 0)),
                pl.BlockSpec((1, n), lambda b: (0, 0)),
            ],
            out_specs=tuple(
                pl.BlockSpec((block_b, n), lambda b: (b, 0))
                for _ in range(6)),
            compiler_params=pltpu.CompilerParams(
                dimension_semantics=("parallel",)),
            cost_estimate=_cost_estimate(b_pad, n),
        )(x, p2)
        if b_pad != B:
            outs = tuple(o[:B] for o in outs)

    ry, rz, a0r, a0i, a1r, a1i = outs
    amp0 = a0r + 1j * a0i
    amp1 = a1r + 1j * a1i
    return ry, rz, amp0, amp1


def quantum_circuit_params_forward(data_vec, trainable_params):
    """Module-faithful forward: one circuit.

    data_vec, trainable_params: (num_qubits,) -> per-qubit (ry, rz, amp0, amp1).
    """
    n = data_vec.shape[0]
    assert trainable_params.shape[0] == n
    ry, rz, amp0, amp1 = quantum_circuit_params_forward_batched(
        data_vec.reshape(1, n), trainable_params)
    return ry[0], rz[0], amp0[0], amp1[0]


if __name__ == "__main__":
    num_qubits = 10

    key = jax.random.PRNGKey(0)
    k_data, k_param, k_batch = jax.random.split(key, 3)

    # trainable_params ~ torch.rand(num_qubits), deterministic
    trainable_params = jax.random.uniform(k_param, (num_qubits,),
                                          dtype=jnp.float32)

    # ---- single circuit (matches the PyTorch module's forward) -------------
    data_vec = jax.random.uniform(k_data, (num_qubits,), dtype=jnp.float32)
    ry, rz, amp0, amp1 = quantum_circuit_params_forward(data_vec,
                                                        trainable_params)
    jax.block_until_ready((ry, rz, amp0, amp1))

    ry_ref = data_vec * trainable_params
    rz_ref = ry_ref / 2.0
    assert jnp.allclose(ry, ry_ref, atol=1e-6)
    assert jnp.allclose(rz, rz_ref, atol=1e-6)
    assert jnp.allclose(jnp.abs(amp0) ** 2 + jnp.abs(amp1) ** 2,
                        jnp.ones(num_qubits), atol=1e-5)

    # ---- batched circuits (amortizes the fixed pallas_call cost) -----------
    B = 1000  # exercises the gridded, batch-parallel path (with batch padding)
    data_mat = jax.random.uniform(k_batch, (B, num_qubits), dtype=jnp.float32)
    ry_b, rz_b, amp0_b, amp1_b = quantum_circuit_params_forward_batched(
        data_mat, trainable_params)
    jax.block_until_ready((ry_b, rz_b, amp0_b, amp1_b))

    ry_ref_b = data_mat * trainable_params[None, :]
    rz_ref_b = ry_ref_b / 2.0
    amp0_ref = jnp.cos(ry_ref_b / 2.0) * jnp.exp(-0.5j * rz_ref_b)
    amp1_ref = jnp.sin(ry_ref_b / 2.0) * jnp.exp(+0.5j * rz_ref_b)
    assert jnp.allclose(ry_b, ry_ref_b, atol=1e-6)
    assert jnp.allclose(rz_b, rz_ref_b, atol=1e-6)
    assert jnp.allclose(jnp.abs(amp0_b) ** 2 + jnp.abs(amp1_b) ** 2,
                        jnp.ones((B, num_qubits)), atol=1e-5)
    assert jnp.allclose(amp0_b, amp0_ref, atol=1e-5)
    assert jnp.allclose(amp1_b, amp1_ref, atol=1e-5)

    print("KERNEL_OK")
</pallas_src>

<mosaic_0001>
module attributes {stable_mosaic.version = 11 : i64} {
  func.func @_qc_kernel(%arg0: memref<1x10xf32, #tpu.memory_space<vmem>>, %arg1: memref<1x10xf32, #tpu.memory_space<vmem>>, %arg2: memref<1x10xf32, #tpu.memory_space<vmem>>, %arg3: memref<1x10xf32, #tpu.memory_space<vmem>>, %arg4: memref<1x10xf32, #tpu.memory_space<vmem>>, %arg5: memref<1x10xf32, #tpu.memory_space<vmem>>, %arg6: memref<1x10xf32, #tpu.memory_space<vmem>>, %arg7: memref<1x10xf32, #tpu.memory_space<vmem>>) attributes {dimension_semantics = [], scalar_prefetch = 0 : i64, scratch_operands = 0 : i64, tpu.core_type = #tpu.core_type<tc>} {
    %c0 = arith.constant 0 : index
    %c0_0 = arith.constant 0 : index
    %0 = vector.load %arg0[%c0, %c0_0] : memref<1x10xf32, #tpu.memory_space<vmem>>, vector<1x10xf32>
    %c0_1 = arith.constant 0 : index
    %c0_2 = arith.constant 0 : index
    %1 = vector.load %arg1[%c0_1, %c0_2] : memref<1x10xf32, #tpu.memory_space<vmem>>, vector<1x10xf32>
    %2 = arith.mulf %0, %1 : vector<1x10xf32>
    %cst = arith.constant 5.000000e-01 : f32
    %3 = vector.broadcast %cst : f32 to vector<1x10xf32>
    %4 = arith.mulf %2, %3 : vector<1x10xf32>
    %cst_3 = arith.constant 5.000000e-01 : f32
    %5 = vector.broadcast %cst_3 : f32 to vector<1x10xf32>
    %6 = arith.mulf %2, %5 : vector<1x10xf32>
    %cst_4 = arith.constant 2.500000e-01 : f32
    %7 = vector.broadcast %cst_4 : f32 to vector<1x10xf32>
    %8 = arith.mulf %2, %7 : vector<1x10xf32>
    %9 = math.cos %6 : vector<1x10xf32>
    %10 = math.sin %6 : vector<1x10xf32>
    %11 = math.cos %8 : vector<1x10xf32>
    %12 = math.sin %8 : vector<1x10xf32>
    %c0_5 = arith.constant 0 : index
    %c0_6 = arith.constant 0 : index
    %13 = vector.load %arg2[%c0_5, %c0_6] : memref<1x10xf32, #tpu.memory_space<vmem>>, vector<1x10xf32>
    tpu.vector_store %arg2[%c0_5, %c0_6], %2 {strides = array<i32>} : memref<1x10xf32, #tpu.memory_space<vmem>>, vector<1x10xf32>,
    %c0_7 = arith.constant 0 : index
    %c0_8 = arith.constant 0 : index
    %14 = vector.load %arg3[%c0_7, %c0_8] : memref<1x10xf32, #tpu.memory_space<vmem>>, vector<1x10xf32>
    tpu.vector_store %arg3[%c0_7, %c0_8], %4 {strides = array<i32>} : memref<1x10xf32, #tpu.memory_space<vmem>>, vector<1x10xf32>,
    %15 = arith.mulf %9, %11 : vector<1x10xf32>
    %c0_9 = arith.constant 0 : index
    %c0_10 = arith.constant 0 : index
    %16 = vector.load %arg4[%c0_9, %c0_10] : memref<1x10xf32, #tpu.memory_space<vmem>>, vector<1x10xf32>
    tpu.vector_store %arg4[%c0_9, %c0_10], %15 {strides = array<i32>} : memref<1x10xf32, #tpu.memory_space<vmem>>, vector<1x10xf32>,
    %cst_11 = arith.constant 0.000000e+00 : f32
    %17 = vector.broadcast %cst_11 : f32 to vector<1x10xf32>
    %18 = arith.subf %17, %9 : vector<1x10xf32>
    %19 = arith.mulf %18, %12 : vector<1x10xf32>
    %c0_12 = arith.constant 0 : index
    %c0_13 = arith.constant 0 : index
    %20 = vector.load %arg5[%c0_12, %c0_13] : memref<1x10xf32, #tpu.memory_space<vmem>>, vector<1x10xf32>
    tpu.vector_store %arg5[%c0_12, %c0_13], %19 {strides = array<i32>} : memref<1x10xf32, #tpu.memory_space<vmem>>, vector<1x10xf32>,
    %21 = arith.mulf %10, %11 : vector<1x10xf32>
    %c0_14 = arith.constant 0 : index
    %c0_15 = arith.constant 0 : index
    %22 = vector.load %arg6[%c0_14, %c0_15] : memref<1x10xf32, #tpu.memory_space<vmem>>, vector<1x10xf32>
    tpu.vector_store %arg6[%c0_14, %c0_15], %21 {strides = array<i32>} : memref<1x10xf32, #tpu.memory_space<vmem>>, vector<1x10xf32>,
    %23 = arith.mulf %10, %12 : vector<1x10xf32>
    %c0_16 = arith.constant 0 : index
    %c0_17 = arith.constant 0 : index
    %24 = vector.load %arg7[%c0_16, %c0_17] : memref<1x10xf32, #tpu.memory_space<vmem>>, vector<1x10xf32>
    tpu.vector_store %arg7[%c0_16, %c0_17], %23 {strides = array<i32>} : memref<1x10xf32, #tpu.memory_space<vmem>>, vector<1x10xf32>,
    return
  }
}

</mosaic_0001>

<bundles_post_ra>
// kernel: tpu_custom_call.1
= control target key start
LH: loop header
LB: loop body
LE: loop exit
PB: predicated region body
PF: predicated region fallthrough
CT: control target
= control target key end

     0   :  { %13 = vsyncpa [#allocation3], 0  ;;  %s1009_s0 = inlined_call_operand.hbm [shape: f32[1,10], index: 0, kind: input, shape index: {}]   ;;  %s1010_s1 = inlined_call_operand.vmem [shape: f32[1,10], index: 1, kind: input, shape index: {}]   ;;  %s1011_s2 = inlined_call_operand.hbm [shape: f32[1,10], index: 2, kind: output, shape index: {0}]   ;;  %s1012_s3 = inlined_call_operand.hbm [shape: f32[1,10], index: 3, kind: output, shape index: {1}]   ;;  %s1013_s4 = inlined_call_operand.hbm [shape: f32[1,10], index: 4, kind: output, shape index: {2}]   ;;  %s1014_s5 = inlined_call_operand.hbm [shape: f32[1,10], index: 5, kind: output, shape index: {3}]   ;;  %s1015_s6 = inlined_call_operand.hbm [shape: f32[1,10], index: 6, kind: output, shape index: {4}]   ;;  %s1016_s7 = inlined_call_operand.hbm [shape: f32[1,10], index: 7, kind: output, shape index: {5}]  }
   0x1   :  { %14 = vsyncpa [#allocation4], 0 }
   0x2   :  { %15 = vsyncpa [#allocation7], 0 }
   0x3   :  { %16 = vsyncpa [#allocation10], 0 }
   0x4   :  { %17 = vsyncpa [#allocation13], 0  ;;  %s756_s24 = smov [#allocation2]   ;;  %s592_s28 = scalar_lea.hbm %s1009_s0, 16 }
   0x5   :  { %s24_s25 = sshll.u32 %s756_s24, 4  ;;  %p593_p0 = scmp.ne.s32.totalorder %s1009_s0, %s592_s28  ;;  %s25_s25 = int_to_ptr.vmem [resolvable:$true] %s24_s25 }
   0x6   :  { %p596_p1 = scmp.lt.u32.totalorder %s592_s28, %s1009_s0 }
   0x8   :  { %p598_p2 = pnand %p596_p1, %p593_p0 }
   0xa   :  { %601 = shalt.err (!%p598_p2)
}
   0xb   :  { %s602_s10 = scalar_lea.vmem %s25_s25, 16  ;;  %s606_s11 = scalar_lea.vmem %s25_s25, 32 }
   0xc   :  { %p603_p3 = scmp.ne.s32.totalorder %s25_s25, %s602_s10  ;;  %p607_p4 = scmp.lt.s32.totalorder %s25_s25, %s25_s25 }
   0xd   :  { %p608_p5 = scmp.lt.s32.totalorder %s606_s11, %s602_s10 }
   0xf   :  { %p609_p6 = por %p608_p5, %p607_p4 }
  0x11   :  { %p610_p7 = pnand %p609_p6, %p603_p3 }
  0x13   :  { %613 = shalt.err (!%p610_p7)
}
  0x14   :  { %27 = dma.hbm_to_vmem [thread:$0]  %s1009_s0, 16, %s25_s25, [#allocation3]  }
  0x15   :  { %746 = dma.done.wait [#allocation3], 16  }
  0x16   :  { %747 = vsyncadd [#allocation3], 4294967280  ;;  %s757_s14 = smov [#allocation5]   ;;  %v33_v0 = vld [vmem:[#allocation2] sm:$0x1]  ;;  %vm452_vm0 = vcmask 73728  }
  0x17   :  { %s470_s15 = sshll.u32 %s757_s14, 4  ;;  %v34_v1 = vld [vmem:[%s1010_s1] sm:$0x1]  ;;  %s758_s18 = smov [#allocation6]   ;;  %s471_s15 = int_to_ptr.vmem [resolvable:$true] %s470_s15 }
  0x18   :  { %s480_s19 = sshll.u32 %s758_s18, 4  ;;  %v35_v2 = vmul.f32 %v34_v1, %v33_v0  ;;  %s614_s0 = scalar_lea.vmem %s471_s15, 16  ;;  %s829_s19 = int_to_ptr.vmem [resolvable:$true] %s480_s19 }
  0x19   :  { %p615_p8 = scmp.ne.s32.totalorder %s471_s15, %s614_s0  ;;  %s618_s20 = scalar_lea.vmem %s471_s15, 32 }
  0x1a   :  { %v824_v3 = vmul.f32 0.5, %v35_v2  ;;  %453 = vst.msk [vmem:[#allocation5] sm:$0x1] %vm452_vm0, %v35_v2  ;;  %v827_v4 = vmul.f32 0.25, %v35_v2  ;;  %p619_p9 = scmp.lt.s32.totalorder %s471_s15, %s471_s15  ;;  %p620_p10 = scmp.lt.s32.totalorder %s618_s20, %s614_s0 }
  0x1c   :  { %p621_p11 = por %p620_p10, %p619_p9 }
  0x1e   :  { %p622_p12 = pnand %p621_p11, %p615_p8 }
  0x20   :  { %625 = shalt.err (!%p622_p12)
}
  0x21   :  { %s626_s22 = scalar_lea.hbm %s1011_s2, 16 }
  0x22   :  { %p627_p13 = scmp.ne.s32.totalorder %s1011_s2, %s626_s22  ;;  %p630_p0 = scmp.lt.u32.totalorder %s626_s22, %s1011_s2 }
  0x24   :  { %p632_p1 = pnand %p630_p0, %p627_p13 }
  0x26   :  { %635 = shalt.err (!%p632_p1)
}
  0x27   :  { %473 = dma.vmem_to_hbm [thread:$0]  %s471_s15, 16, %s1011_s2, [#allocation4]   ;;  %v41_v5 = vand.u32 2139095040, %v824_v3  ;;  %454 = vst.msk [vmem:[#allocation6] sm:$0x1] %vm452_vm0, %v824_v3  ;;  %v248_v8 = vand.u32 2139095040, %v827_v4 }
  0x28   :  { %v38_v6 = vand.u32 2147483647, %v824_v3  ;;  %v245_v7 = vand.u32 2147483647, %v827_v4  ;;  %s636_s29 = scalar_lea.vmem %s829_s19, 16  ;;  %s640_s30 = scalar_lea.vmem %s829_s19, 32 }
  0x29   :  { %p637_p2 = scmp.ne.s32.totalorder %s829_s19, %s636_s29  ;;  %p641_p3 = scmp.lt.s32.totalorder %s829_s19, %s829_s19 }
  0x2a   :  { %p642_p4 = scmp.lt.s32.totalorder %s640_s30, %s636_s29 }
  0x2c   :  { %p643_p5 = por %p642_p4, %p641_p3 }
  0x2e   :  { %p644_p6 = pnand %p643_p5, %p637_p2 }
  0x30   :  { %647 = shalt.err (!%p644_p6)
}
  0x31   :  { %s648_s9 = scalar_lea.hbm %s1012_s3, 16 }
  0x32   :  { %p649_p7 = scmp.ne.s32.totalorder %s1012_s3, %s648_s9  ;;  %p652_p8 = scmp.lt.u32.totalorder %s648_s9, %s1012_s3 }
  0x34   :  { %p654_p9 = pnand %p652_p8, %p649_p7 }
  0x36   :  { %657 = shalt.err (!%p654_p9)
}
  0x37   :  { %483 = dma.vmem_to_hbm [thread:$0]  %s829_s19, 16, %s1012_s3, [#allocation7]   ;;  %v42_v9 = vshrl.u32 %v41_v5, 23  ;;  %v45_v10 = vand.u32 8388607, %v38_v6  ;;  %v249_v11 = vshrl.u32 %v248_v8, 23 }
  0x38   :  { %v252_v12 = vand.u32 8388607, %v245_v7  ;;  %v759_v27 = vmov 683565275   ;;  %v760_v29 = vmov 2475754826  }
  0x39   :  { %v547_v13 = vadd.s32 4294967169, %v42_v9  ;;  %v555_v14 = vadd.s32 4294967169, %v249_v11  ;;  %v46_v16 = vor.u32 8388608, %v45_v10  ;;  %v761_v31 = vmov 2131351028   ;;  %s765_s3 = smov [#allocation9]  }
  0x3a   :  { %v253_v17 = vor.u32 8388608, %v252_v12  ;;  %v762_v33 = vmov 2102212464   ;;  %v763_v35 = vmov 920167782   ;;  %vm40_vm15 = vcmp.lt.s32.totalorder %v824_v3, 0 }
  0x3b   :  { %v48_v15 = vadd.s32 1, %v547_v13  ;;  %v255_v18 = vadd.s32 1, %v555_v14  ;;  %v871_v23 = vshll.u32 %v46_v16, 8  ;;  %v764_v43 = vmov 1326507024   ;;  %s500_s16 = sshll.u32 %s765_s3, 4  ;;  %s501_s16 = int_to_ptr.vmem [resolvable:$true] %s500_s16 }
  0x3c   :  { %v873_v25 = vshll.u32 %v253_v17, 8  ;;  %s766_s17 = smov [#allocation8]   ;;  %s767_s19 = smov [#allocation11]  }
  0x3d   :  { %vm49_vm1 = vcmp.gt.s32.totalorder %v48_v15, 0  ;;  %vm256_vm2 = vcmp.gt.s32.totalorder %v255_v18, 0  ;;  %s490_s18 = sshll.u32 %s766_s17, 4  ;;  %s510_s0 = sshll.u32 %s767_s19, 4  ;;  %s933_s18 = int_to_ptr.vmem [resolvable:$true] %s490_s18  ;;  %s939_s0 = int_to_ptr.vmem [resolvable:$true] %s510_s0 }
  0x3e   :  { %v50_v19 = vsel %vm49_vm1, %v48_v15, 0  ;;  %v257_v22 = vsel %vm256_vm2, %v255_v18, 0  ;;  %vm39_vm1 = vcmp.le.f32.partialorder %v38_v6, 0.7853982  ;;  %vm247_vm2 = vcmp.lt.s32.totalorder %v827_v4, 0  ;;  %s768_s20 = smov [#allocation12]   ;;  %p663_p11 = scmp.lt.s32.totalorder %s501_s16, %s501_s16 }
  0x3f   :  { %v51_v20 = vshrl.u32 %v50_v19, 5  ;;  %v52_v21 = vand.u32 31, %v50_v19  ;;  %v259_v24 = vand.u32 31, %v257_v22  ;;  %v875_v37 = vshrl.u32 %v257_v22, 5  ;;  %s520_s1 = sshll.u32 %s768_s20, 4  ;;  %s658_s21 = scalar_lea.vmem %s501_s16, 16  ;;  %s941_s1 = int_to_ptr.vmem [resolvable:$true] %s520_s1 }
  0x40   :  { %p659_p10 = scmp.ne.s32.totalorder %s501_s16, %s658_s21  ;;  %s662_s22 = scalar_lea.vmem %s501_s16, 32 }
  0x41   :  { %v53_v26 = vsub.s32 32, %v52_v21  ;;  %v55_v28 = vshll.u32 %v759_v27, %v52_v21  ;;  %v58_v30 = vshll.u32 %v760_v29, %v52_v21  ;;  %v61_v32 = vshll.u32 %v761_v31, %v52_v21  ;;  %p664_p12 = scmp.lt.s32.totalorder %s662_s22, %s658_s21 }
  0x42   :  { %v64_v34 = vshll.u32 %v762_v33, %v52_v21  ;;  %v67_v36 = vshll.u32 %v763_v35, %v52_v21  ;;  %vm70_vm3 = vcmp.lt.s32.totalorder %v51_v20, 1  ;;  %vm71_vm4 = vcmp.lt.s32.totalorder %v51_v20, 2 }
  0x43   :  { %v54_v38 = vshrl.u32 %v759_v27, %v53_v26  ;;  %v56_v39 = vshrl.u32 %v760_v29, %v53_v26  ;;  %v59_v40 = vshrl.u32 %v761_v31, %v53_v26  ;;  %v62_v41 = vshrl.u32 %v762_v33, %v53_v26  ;;  %p665_p13 = por %p664_p12, %p663_p11 }
  0x44   :  { %v65_v42 = vshrl.u32 %v763_v35, %v53_v26  ;;  %v68_v44 = vshrl.u32 %v764_v43, %v53_v26  ;;  %vm73_vm5 = vcmp.lt.s32.totalorder %v51_v20, 4  ;;  %v260_v48 = vsub.s32 32, %v259_v24 }
  0x45   :  { %v57_v45 = vor.u32 %v56_v39, %v55_v28  ;;  %v60_v46 = vor.u32 %v59_v40, %v58_v30  ;;  %v63_v47 = vor.u32 %v62_v41, %v61_v32  ;;  %vm72_vm6 = vcmp.lt.s32.totalorder %v51_v20, 3  ;;  %p666_p0 = pnand %p665_p13, %p659_p10 }
  0x46   :  { %v66_v49 = vor.u32 %v65_v42, %v64_v34  ;;  %v69_v50 = vor.u32 %v68_v44, %v67_v36  ;;  %v262_v51 = vshll.u32 %v759_v27, %v259_v24  ;;  %v265_v59 = vshll.u32 %v760_v29, %v259_v24 }
  0x47   :  { %v74_v52 = vsel %vm70_vm3, %v54_v38, %v57_v45  ;;  %v75_v53 = vsel %vm73_vm5, %v63_v47, 2102212464  ;;  %v78_v54 = vsel %vm70_vm3, %v57_v45, %v60_v46  ;;  %v82_v55 = vsel %vm70_vm3, %v60_v46, %v63_v47 }
  0x48   :  { %v76_v56 = vsel %vm72_vm6, %v60_v46, %v75_v53  ;;  %v79_v57 = vsel %vm73_vm5, %v66_v49, 920167782  ;;  %v83_v58 = vsel %vm73_vm5, %v69_v50, 1326507024  ;;  %v261_v62 = vshrl.u32 %v759_v27, %v260_v48 }
  0x49   :  { %v80_v60 = vsel %vm72_vm6, %v63_v47, %v79_v57  ;;  %v84_v61 = vsel %vm72_vm6, %v66_v49, %v83_v58  ;;  %v263_v63 = vshrl.u32 %v760_v29, %v260_v48  ;;  %v77_v0 = vsel %vm71_vm4, %v74_v52, %v76_v56 }
  0x4a   :  { %v81_v1 = vsel %vm71_vm4, %v78_v54, %v80_v60  ;;  %v85_v2 = vsel %vm71_vm4, %v82_v55, %v84_v61  ;;  %v266_v5 = vshrl.u32 %v761_v31, %v260_v48  ;;  %v268_v14 = vshll.u32 %v761_v31, %v259_v24 }
  0x4b   :  { %v884_v8 = vmul.u32.u64.low %v871_v23, %v85_v2  ;;  %v885_v9 = vmul.u32.u64.high %v871_v23, %v85_v2, %v884_v8  ;;  %v888_v10 = vmul.u32.u64.low %v871_v23, %v81_v1  ;;  %v889_v11 = vmul.u32.u64.high %v871_v23, %v81_v1, %v888_v10 }
  0x4c   :  { %v264_v12 = vor.u32 %v263_v63, %v262_v51  ;;  %v267_v13 = vor.u32 %v266_v5, %v265_v59  ;;  %v269_v15 = vshrl.u32 %v762_v33, %v260_v48  ;;  %v271_v16 = vshll.u32 %v762_v33, %v259_v24 }
  0x4d   :  { %v272_v17 = vshrl.u32 %v763_v35, %v260_v48  ;;  %v274_v18 = vshll.u32 %v763_v35, %v259_v24  ;;  %v275_v19 = vshrl.u32 %v764_v43, %v260_v48  ;;  %v93_v20 = vmul.u32 %v871_v23, %v77_v0 }
  0x4e   :  { %v270_v21 = vor.u32 %v269_v15, %v268_v14  ;;  %vm277_vm7 = vcmp.lt.s32.totalorder %v875_v37, 1  ;;  %vm278_vm8 = vcmp.lt.s32.totalorder %v875_v37, 2  ;;  %vm95_vm9 = vc.u32 %v885_v9, %v888_v10 }
  0x4f   :  { %v96_v22 = vadd.s32 1, %v889_v11  ;;  %v273_v26 = vor.u32 %v272_v17, %v271_v16  ;;  %vm279_vm10 = vcmp.lt.s32.totalorder %v875_v37, 3  ;;  %v276_v27 = vor.u32 %v275_v19, %v274_v18 }
  0x50   :  { %vm280_vm11 = vcmp.lt.s32.totalorder %v875_v37, 4  ;;  %v281_v28 = vsel %vm277_vm7, %v261_v62, %v264_v12  ;;  %v285_v24 = vsel %vm277_vm7, %v264_v12, %v267_v13  ;;  %v289_v31 = vsel %vm277_vm7, %v267_v13, %v270_v21 }
  0x51   :  { %v97_v29 = vsel %vm95_vm9, %v96_v22, %v889_v11  ;;  %v282_v23 = vsel %vm280_vm11, %v270_v21, 2102212464  ;;  %v286_v30 = vsel %vm280_vm11, %v273_v26, 920167782  ;;  %v290_v35 = vsel %vm280_vm11, %v276_v27, 1326507024 }
  0x52   :  { %v98_v32 = vadd.s32 %v97_v29, %v93_v20  ;;  %v283_v33 = vsel %vm279_vm10, %v267_v13, %v282_v23  ;;  %v287_v34 = vsel %vm279_vm10, %v270_v21, %v286_v30  ;;  %v291_v39 = vsel %vm279_vm10, %v273_v26, %v290_v35 }
  0x53   :  { %v284_v36 = vsel %vm278_vm8, %v281_v28, %v283_v33  ;;  %v288_v38 = vsel %vm278_vm8, %v285_v24, %v287_v34  ;;  %v292_v41 = vsel %vm278_vm8, %v289_v31, %v291_v39  ;;  %v94_v60 = vadd.s32 %v888_v10, %v885_v9 }
  0x54   :  { %v99_v40 = vadd.s32 536870912, %v98_v32  ;;  %v906_v42 = vmul.u32.u64.low %v873_v25, %v288_v38  ;;  %v907_v43 = vmul.u32.u64.high %v873_v25, %v288_v38, %v906_v42  ;;  %v300_v47 = vmul.u32 %v873_v25, %v284_v36 }
  0x55   :  { %v910_v44 = vmul.u32.u64.low %v873_v25, %v292_v41  ;;  %v911_v45 = vmul.u32.u64.high %v873_v25, %v292_v41, %v910_v44  ;;  %vm246_vm3 = vcmp.le.f32.partialorder %v245_v7, 0.7853982  ;;  %vm130_vm9 = vweird.f32 %v824_v3 }
  0x56   :  { %v100_v46 = vshrl.u32 %v99_v40, 30  ;;  %v303_v49 = vadd.s32 1, %v907_v43 }
  0x57   :  { %vm302_vm12 = vc.u32 %v911_v45, %v906_v42  ;;  %v301_v16 = vadd.s32 %v906_v42, %v911_v45 }
  0x58   :  { %v101_v48 = vshll.u32 %v100_v46, 30  ;;  %v304_v37 = vsel %vm302_vm12, %v303_v49, %v907_v43  ;;  %v124_v27 = vsub.s32 4, %v100_v46 }
  0x59   :  { %v305_v51 = vadd.s32 %v304_v37, %v300_v47 }
  0x5a   :  { %v102_v50 = vsub.s32 %v98_v32, %v101_v48  ;;  %v125_v32 = vsel %vm40_vm15, %v124_v27, %v100_v46 }
  0x5b   :  { %v306_v53 = vadd.s32 536870912, %v305_v51  ;;  %v127_v35 = vsel %vm39_vm1, 0, %v125_v32 }
  0x5c   :  { %v104_v52 = vsub.s32 0, %v102_v50  ;;  %v131_v39 = vand.u32 3, %v127_v35  ;;  %v234_v40 = vadd.s32 3, %v127_v35 }
  0x5d   :  { %v307_v55 = vshrl.u32 %v306_v53, 30 }
  0x5e   :  { %v548_v54 = vmin.u32 %v104_v52, %v102_v50  ;;  %vm136_vm4 = vcmp.eq.s32.totalorder %v131_v39, 2  ;;  %v235_v45 = vand.u32 3, %v234_v40  ;;  %vm133_vm5 = vcmp.eq.s32.totalorder %v131_v39, 0 }
  0x5f   :  { %v308_v57 = vshll.u32 %v307_v55, 30  ;;  %v331_v34 = vsub.s32 4, %v307_v55  ;;  %vm132_vm6 = vcmp.lt.s32.totalorder %v131_v39, 2 }
  0x60   :  { %v106_v56 = vclz %v548_v54  ;;  %vm237_vm7 = vcmp.eq.s32.totalorder %v235_v45, 0  ;;  %vm240_vm8 = vcmp.eq.s32.totalorder %v235_v45, 2  ;;  %vm236_vm10 = vcmp.lt.s32.totalorder %v235_v45, 2 }
  0x61   :  { %v309_v59 = vsub.s32 %v305_v51, %v308_v57  ;;  %v332_v38 = vsel %vm247_vm2, %v331_v34, %v307_v55 }
  0x62   :  { %v549_v58 = vadd.s32 4294967294, %v106_v56  ;;  %v334_v43 = vsel %vm246_vm3, 0, %v332_v38 }
  0x63   :  { %v311_v61 = vsub.s32 0, %v309_v59  ;;  %v441_v48 = vadd.s32 3, %v334_v43  ;;  %v338_v51 = vand.u32 3, %v334_v43 }
  0x64   :  { %vm550_vm13 = vcmp.lt.s32.totalorder %v549_v58, 0 }
  0x65   :  { %v109_v25 = vsel %vm550_vm13, 0, %v549_v58  ;;  %v556_v1 = vmin.u32 %v311_v61, %v309_v59  ;;  %v442_v37 = vand.u32 3, %v441_v48  ;;  %vm343_vm12 = vcmp.eq.s32.totalorder %v338_v51, 2 }
  0x66   :  { %v110_v62 = vsub.s32 32, %v109_v25  ;;  %v111_v63 = vshll.u32 %v102_v50, %v109_v25  ;;  %v114_v0 = vsub.s32 4294967266, %v109_v25 }
  0x67   :  { %v313_v8 = vclz %v556_v1  ;;  %vm447_vm11 = vcmp.eq.s32.totalorder %v442_v37, 2  ;;  %vm444_vm13 = vcmp.eq.s32.totalorder %v442_v37, 0 }
  0x68   :  { %v112_v2 = vshrl.u32 %v94_v60, %v110_v62  ;;  %v115_v5 = vadd.s32 127, %v114_v0 }
  0x69   :  { %v557_v13 = vadd.s32 4294967294, %v313_v8 }
  0x6a   :  { %v113_v11 = vor.u32 %v112_v2, %v111_v63  ;;  %v116_v12 = vshll.u32 %v115_v5, 23 }
  0x6b   :  { %vm558_vm14 = vcmp.lt.s32.totalorder %v557_v13, 0 }
  0x6c   :  { %v117_v14 = vor.u32 4788187, %v116_v12  ;;  %v120_v15 = vcvt.s32.f32 %v113_v11  ;;  %v316_v9 = vsel %vm558_vm14, 0, %v557_v13  ;;  %vm340_vm14 = vcmp.eq.s32.totalorder %v338_v51, 0 }
  0x6d   :  { %v317_v10 = vsub.s32 32, %v316_v9  ;;  %v318_v18 = vshll.u32 %v309_v59, %v316_v9  ;;  %v321_v19 = vsub.s32 4294967266, %v316_v9 }
  0x6e   :  { %v118_v17 = vand.u32 2147483647, %v117_v14 }
  0x6f   :  { %v319_v21 = vshrl.u32 %v301_v16, %v317_v10  ;;  %v322_v22 = vadd.s32 127, %v321_v19 }
  0x70   :  { %v121_v20 = vmul.f32 %v120_v15, %v118_v17 }
  0x71   :  { %v320_v28 = vor.u32 %v319_v21, %v318_v18  ;;  %v323_v24 = vshll.u32 %v322_v22, 23 }
  0x72   :  { %v122_v26 = vxor.u32 2147483648, %v121_v20 }
  0x73   :  { %v324_v30 = vor.u32 4788187, %v323_v24  ;;  %v327_v31 = vcvt.s32.f32 %v320_v28 }
  0x74   :  { %v123_v29 = vsel %vm40_vm15, %v122_v26, %v121_v20  ;;  %vm443_vm15 = vcmp.lt.s32.totalorder %v442_v37, 2 }
  0x75   :  { %v126_v23 = vsel %vm39_vm1, %v824_v3, %v123_v29  ;;  %v325_v33 = vand.u32 2147483647, %v324_v30  ;;  %vm339_vm1 = vcmp.lt.s32.totalorder %v338_v51, 2 }
  0x76   :  { %584 = vcosq.f32 %v126_v23 }
  0x77   :  { %586 = vsinq.f32 %v126_v23  ;;  %v328_v36 = vmul.f32 %v327_v31, %v325_v33 }
  0x79   :  { %v329_v6 = vxor.u32 2147483648, %v328_v36 }
  0x7b   :  { %v330_v41 = vsel %vm247_vm2, %v329_v6, %v328_v36  ;;  %vm337_vm2 = vweird.f32 %v827_v4 }
  0x7c   :  { %v333_v42 = vsel %vm246_vm3, %v827_v4, %v330_v41 }
  0x7d   :  { %588 = vcosq.f32 %v333_v42 }
  0x7e   :  { %590 = vsinq.f32 %v333_v42 }
  0x80   :  { %v585_v44 = vpop.eup %584 }
  0x81   :  { %v587_v46 = vpop.eup %586  ;;  %v137_v47 = vxor.u32 2147483648, %v585_v44 }
  0x82   :  { %v134_v49 = vxor.u32 2147483648, %v587_v46 }
  0x83   :  { %v138_v7 = vsel %vm136_vm4, %v137_v47, %v587_v46  ;;  %v242_v54 = vsel %vm240_vm8, %v137_v47, %v587_v46 }
  0x84   :  { %v135_v50 = vsel %vm133_vm5, %v585_v44, %v134_v49  ;;  %v239_v53 = vsel %vm237_vm7, %v585_v44, %v134_v49 }
  0x85   :  { %v139_v52 = vsel %vm132_vm6, %v135_v50, %v138_v7  ;;  %v243_v59 = vsel %vm236_vm10, %v239_v53, %v242_v54 }
  0x86   :  { %v140_v56 = vsel %vm130_vm9, nan, %v139_v52  ;;  %v244_v1 = vsel %vm130_vm9, nan, %v243_v59 }
  0x87   :  { %v589_v55 = vpop.eup %588  ;;  %v457_v61 = vsub.f32 0.0, %v140_v56 }
  0x88   :  { %v591_v57 = vpop.eup %590  ;;  %v344_v58 = vxor.u32 2147483648, %v589_v55 }
  0x89   :  { %v341_v60 = vxor.u32 2147483648, %v591_v57 }
  0x8a   :  { %v449_v25 = vsel %vm447_vm11, %v344_v58, %v591_v57  ;;  %v345_v62 = vsel %vm343_vm12, %v344_v58, %v591_v57 }
  0x8b   :  { %v446_v63 = vsel %vm444_vm13, %v589_v55, %v341_v60  ;;  %v342_v0 = vsel %vm340_vm14, %v589_v55, %v341_v60 }
  0x8c   :  { %v450_v2 = vsel %vm443_vm15, %v446_v63, %v449_v25  ;;  %v346_v5 = vsel %vm339_vm1, %v342_v0, %v345_v62 }
  0x8d   :  { %v451_v8 = vsel %vm337_vm2, nan, %v450_v2  ;;  %v347_v11 = vsel %vm337_vm2, nan, %v346_v5 }
  0x8e   :  { %v458_v4 = vmul.f32 %v457_v61, %v451_v8  ;;  %v455_v12 = vmul.f32 %v347_v11, %v140_v56  ;;  %v460_v13 = vmul.f32 %v347_v11, %v244_v1  ;;  %v462_v14 = vmul.f32 %v451_v8, %v244_v1 }
  0x90   :  { %459 = vst.msk [vmem:[#allocation9] sm:$0x1] %vm452_vm0, %v458_v4  ;;  %456 = vst.msk [vmem:[#allocation8] sm:$0x1] %vm452_vm0, %v455_v12 }
  0x91   :  { %461 = vst.msk [vmem:[#allocation11] sm:$0x1] %vm452_vm0, %v460_v13  ;;  %463 = vst.msk [vmem:[#allocation12] sm:$0x1] %vm452_vm0, %v462_v14 }
  0x92   :  { %669 = shalt.err (!%p666_p0)
}
  0x93   :  { %s670_s25 = scalar_lea.hbm %s1014_s5, 16 }
  0x94   :  { %p671_p1 = scmp.ne.s32.totalorder %s1014_s5, %s670_s25  ;;  %p674_p2 = scmp.lt.u32.totalorder %s670_s25, %s1014_s5 }
  0x96   :  { %p676_p3 = pnand %p674_p2, %p671_p1 }
  0x98   :  { %679 = shalt.err (!%p676_p3)
}
  0x99   :  { %503 = dma.vmem_to_hbm [thread:$0]  %s501_s16, 16, %s1014_s5, [#allocation10]  }
  0x9a   :  { %s680_s8 = scalar_lea.vmem %s933_s18, 16  ;;  %s684_s9 = scalar_lea.vmem %s933_s18, 32 }
  0x9b   :  { %p681_p4 = scmp.ne.s32.totalorder %s933_s18, %s680_s8  ;;  %p685_p5 = scmp.lt.s32.totalorder %s933_s18, %s933_s18 }
  0x9c   :  { %p686_p6 = scmp.lt.s32.totalorder %s684_s9, %s680_s8 }
  0x9e   :  { %p687_p7 = por %p686_p6, %p685_p5 }
  0xa0   :  { %p688_p8 = pnand %p687_p7, %p681_p4 }
  0xa2   :  { %691 = shalt.err (!%p688_p8)
}
  0xa3   :  { %s692_s12 = scalar_lea.hbm %s1013_s4, 16 }
  0xa4   :  { %p693_p9 = scmp.ne.s32.totalorder %s1013_s4, %s692_s12  ;;  %p696_p10 = scmp.lt.u32.totalorder %s692_s12, %s1013_s4 }
  0xa6   :  { %p698_p11 = pnand %p696_p10, %p693_p9 }
  0xa8   :  { %701 = shalt.err (!%p698_p11)
}
  0xa9   :  { %493 = dma.vmem_to_hbm [thread:$0]  %s933_s18, 16, %s1013_s4, [#allocation7]  }
  0xaa   :  { %s702_s17 = scalar_lea.vmem %s939_s0, 16  ;;  %s706_s19 = scalar_lea.vmem %s939_s0, 32 }
  0xab   :  { %p703_p12 = scmp.ne.s32.totalorder %s939_s0, %s702_s17  ;;  %p707_p13 = scmp.lt.s32.totalorder %s939_s0, %s939_s0 }
  0xac   :  { %p708_p0 = scmp.lt.s32.totalorder %s706_s19, %s702_s17 }
  0xae   :  { %p709_p1 = por %p708_p0, %p707_p13 }
  0xb0   :  { %p710_p2 = pnand %p709_p1, %p703_p12 }
  0xb2   :  { %713 = shalt.err (!%p710_p2)
}
  0xb3   :  { %s714_s22 = scalar_lea.hbm %s1015_s6, 16 }
  0xb4   :  { %p715_p3 = scmp.ne.s32.totalorder %s1015_s6, %s714_s22  ;;  %p718_p4 = scmp.lt.u32.totalorder %s714_s22, %s1015_s6 }
  0xb6   :  { %p720_p5 = pnand %p718_p4, %p715_p3 }
  0xb8   :  { %723 = shalt.err (!%p720_p5)
}
  0xb9   :  { %513 = dma.vmem_to_hbm [thread:$0]  %s939_s0, 16, %s1015_s6, [#allocation10]  }
  0xba   :  { %s724_s27 = scalar_lea.vmem %s941_s1, 16  ;;  %s728_s28 = scalar_lea.vmem %s941_s1, 32 }
  0xbb   :  { %p725_p6 = scmp.ne.s32.totalorder %s941_s1, %s724_s27  ;;  %p729_p7 = scmp.lt.s32.totalorder %s941_s1, %s941_s1 }
  0xbc   :  { %p730_p8 = scmp.lt.s32.totalorder %s728_s28, %s724_s27 }
  0xbe   :  { %p731_p9 = por %p730_p8, %p729_p7 }
  0xc0   :  { %p732_p10 = pnand %p731_p9, %p725_p6 }
  0xc2   :  { %735 = shalt.err (!%p732_p10)
}
  0xc3   :  { %s736_s2 = scalar_lea.hbm %s1016_s7, 16 }
  0xc4   :  { %p737_p11 = scmp.ne.s32.totalorder %s1016_s7, %s736_s2  ;;  %p740_p12 = scmp.lt.u32.totalorder %s736_s2, %s1016_s7 }
  0xc6   :  { %p742_p13 = pnand %p740_p12, %p737_p11 }
  0xc8   :  { %745 = shalt.err (!%p742_p13)
}
  0xc9   :  { %523 = dma.vmem_to_hbm [thread:$0]  %s941_s1, 16, %s1016_s7, [#allocation13]  }
  0xca   :  { %748 = dma.done.wait [#allocation4], 16  }
  0xcb   :  { %749 = vsyncadd [#allocation4], 4294967280 }
  0xcc   :  { %750 = dma.done.wait [#allocation7], 32  }
  0xcd   :  { %751 = vsyncadd [#allocation7], 4294967264 }
  0xce   :  { %752 = dma.done.wait [#allocation10], 32  }
  0xcf   :  { %753 = vsyncadd [#allocation10], 4294967264 }
  0xd0   :  { %754 = dma.done.wait [#allocation13], 16  }
  0xd1   :  { %755 = vsyncadd [#allocation13], 4294967280 }
  0xd2   :  { %542 = vsyncpa [#allocation3], 1 }
  0xd3   :  { %543 = vsyncpa [#allocation4], 1 }
  0xd4   :  { %544 = vsyncpa [#allocation7], 1 }
  0xd5   :  { %545 = vsyncpa [#allocation10], 1 }
  0xd6   :  { %546 = vsyncpa [#allocation13], 1 }

</bundles_post_ra>
